<compile_context>
chip_gen: v5e
topology: v5e:2x2
jax: 0.10.0
libtpu: 0.0.40
codegen_flags: <defaults>
</compile_context>

<pallas_src>
import jax
import jax.numpy as jnp
from jax import lax
from jax.experimental import pallas as pl
from jax.experimental.pallas import tpu as pltpu

EPS = 1e-5
LANE = 128


def _vmem_budgets():
    """Generation-aware budgets: ~128 MiB physical on v5e/v6e, 64 MiB on v7x."""
    phys = 64 * 1024 * 1024
    try:
        info = pltpu.get_tpu_info()
        phys = int(getattr(info, "vmem_capacity_bytes", phys))
    except Exception:
        pass
    if phys >= 100 * 1024 * 1024:                  # v5e / v6e
        return 64 * 1024 * 1024, 96 * 1024 * 1024
    return 24 * 1024 * 1024, 48 * 1024 * 1024      # v7x / unknown (conservative)


VMEM_BUDGET, VMEM_LIMIT = _vmem_budgets()


def round_up(x, m):
    return ((x + m - 1) // m) * m


def choose_row_tile(L, bytes_per_row, budget, max_rows=2048):
    """Row tile (multiple of 8) whose per-step footprint fits `budget`.
    Prefers an exact divisor of L (no padding); otherwise the caller zero-pads
    the row axis up to a multiple of the returned tile."""
    cap = max(8, min(round_up(L, 8), max_rows))
    fit = max(8, min(cap, (budget // max(bytes_per_row, 1)) // 8 * 8))
    if L % 8 == 0:
        best_div, t = 8, 8
        while t <= fit:
            if L % t == 0:
                best_div = t
            t += 8
        if 2 * best_div >= fit:           # exact divisor is good enough -> no padding
            return best_div
    return fit


def choose_cout_tile(Cout, fixed_bytes, per_cout_bytes, budget):
    """Largest multiple-of-128 divisor of Cout whose footprint fits the budget."""
    best, t = LANE, LANE
    while t <= Cout:
        if Cout % t == 0 and fixed_bytes + t * per_cout_bytes <= budget:
            best = t
        t += LANE
    return best


# ----------------------------------------------------------------------------
# Fused 1x1 conv + folded BN (+ fused projection shortcut / residual) + ReLU
# ----------------------------------------------------------------------------
def fused_pointwise(x, w_e, scale, bias, est_ids, *,
                    x2=None, w2_e=None, scale2=None, bias2=None,
                    residual=None, relu=True, out_dtype=jnp.bfloat16):
    """out = act( x @ w_e[est] * scale + bias
                 [+ x2 @ w2_e[est] * scale2 + bias2]     (fused projection shortcut)
                 [+ residual] )                          (identity shortcut)

    x: (N, L, K) bf16; w_e: (E, K, Cout) bf16 (mask already folded per estimator);
    scale/bias: (1, Cout) f32; est_ids: (N,) int32 scalar-prefetch operand."""
    N, L, K = x.shape
    E, _, Cout = w_e.shape
    has_proj = x2 is not None
    has_res = residual is not None

    out_bytes = jnp.dtype(out_dtype).itemsize
    # double-buffered per-row bytes (x tile + out tile [+ proj tile] [+ residual tile])
    row_bytes = 2 * (K * 2 + Cout * out_bytes)
    weight_bytes = 2 * K * Cout * 2
    if has_proj:
        K2 = x2.shape[2]
        row_bytes += 2 * K2 * 2
        weight_bytes += 2 * K2 * Cout * 2
    if has_res:
        row_bytes += 2 * Cout * residual.dtype.itemsize
    budget = max(VMEM_BUDGET - weight_bytes, 8 * row_bytes)
    TL = choose_row_tile(L, row_bytes, budget)
    LP = round_up(L, TL)
    if LP != L:                                   # rare: awkward spatial extents
        padrows = lambda a: jnp.pad(a, ((0, 0), (0, LP - L), (0, 0)))
        x = padrows(x)
        if has_proj:
            x2 = padrows(x2)
        if has_res:
            residual = padrows(residual)

    def kernel(est_ref, *refs):
        del est_ref
        x_ref, w_ref, s_ref, b_ref = refs[:4]
        i = 4
        if has_proj:
            x2_ref, w2_ref, s2_ref, b2_ref = refs[i:i + 4]
            i += 4
        if has_res:
            r_ref = refs[i]
            i += 1
        o_ref = refs[i]

        acc = jnp.dot(x_ref[0], w_ref[0], preferred_element_type=jnp.float32)
        acc = acc * s_ref[...] + b_ref[...]               # folded BN (single f32 FMA)
        if has_proj:
            acc2 = jnp.dot(x2_ref[0], w2_ref[0], preferred_element_type=jnp.float32)
            acc = acc + acc2 * s2_ref[...] + b2_ref[...]
        if has_res:
            acc = acc + r_ref[0].astype(jnp.float32)
        if relu:
            acc = jnp.maximum(acc, 0.0)
        o_ref[0] = acc.astype(o_ref.dtype)

    # TODO(synk): if xprof shows exposed DMA on the x / residual tiles, sweep
    # pipeline_mode=pl.Buffered(3) on those BlockSpecs (review #12).
    in_specs = [
        pl.BlockSpec((1, TL, K), lambda n, l, est: (n, l, 0)),
        pl.BlockSpec((1, K, Cout), lambda n, l, est: (est[n], 0, 0)),   # per-estimator weights
        pl.BlockSpec((1, Cout), lambda n, l, est: (0, 0)),
        pl.BlockSpec((1, Cout), lambda n, l, est: (0, 0)),
    ]
    args = [x, w_e, scale, bias]
    if has_proj:
        in_specs += [
            pl.BlockSpec((1, TL, K2), lambda n, l, est: (n, l, 0)),
            pl.BlockSpec((1, K2, Cout), lambda n, l, est: (est[n], 0, 0)),
            pl.BlockSpec((1, Cout), lambda n, l, est: (0, 0)),
            pl.BlockSpec((1, Cout), lambda n, l, est: (0, 0)),
        ]
        args += [x2, w2_e, scale2, bias2]
    if has_res:
        in_specs.append(pl.BlockSpec((1, TL, Cout), lambda n, l, est: (n, l, 0)))
        args.append(residual)

    out = pl.pallas_call(
        kernel,
        out_shape=jax.ShapeDtypeStruct((N, LP, Cout), out_dtype),
        grid_spec=pltpu.PrefetchScalarGridSpec(
            num_scalar_prefetch=1,
            grid=(N, LP // TL),
            in_specs=in_specs,
            out_specs=pl.BlockSpec((1, TL, Cout), lambda n, l, est: (n, l, 0)),
        ),
        compiler_params=pltpu.CompilerParams(
            dimension_semantics=("parallel", "parallel"),
            vmem_limit_bytes=VMEM_LIMIT,
        ),
    )(est_ids, *args)
    return out[:, :L, :] if LP != L else out


# ----------------------------------------------------------------------------
# Fused 3x3 conv (pad=1, stride=1) + folded BN + ReLU
# - consumes conv1's output directly (no HBM pad / phase repack)
# - in-kernel zero-padded kw-expansion (3 shifted VMEM copies, built once per
#   sample and reused across Cout tiles) -> 3 matmuls with K = 3C
# ----------------------------------------------------------------------------
def _conv3x3_s1(x_nhwc, w_e, scale, bias, est_ids):
    N, H, W, C = x_nhwc.shape
    E, _, Cout = w_e.shape
    Lo = H * W

    fixed = 2 * H * W * C * 2 + (H + 2) * W * 3 * C * 2          # x dbl-buf + xk scratch
    per_cout = 2 * 9 * C * 2 + 2 * Lo * 2 + Lo * 4               # weights + out + acc
    tco = choose_cout_tile(Cout, fixed, per_cout, VMEM_BUDGET)
    nj = Cout // tco
    # TODO(synk): add halo row-tiling if fixed footprint ever exceeds the budget
    # for extreme spatial sizes (not the case for standard ResNet stages).

    def kernel(est_ref, x_ref, w_ref, s_ref, b_ref, o_ref, xk_ref, acc_ref):
        del est_ref

        # Build the zero-padded, kw-expanded image once per sample (j == 0) and
        # reuse it across Cout tiles.  xk[h, w, kw*C + c] = x[h-1, w+kw-1, c].
        @pl.when(pl.program_id(1) == 0)
        def _():
            xk_ref[...] = jnp.zeros_like(xk_ref)
            xk_ref[1:H + 1, 1:W, 0:C] = x_ref[0, :, 0:W - 1, :]
            xk_ref[1:H + 1, :, C:2 * C] = x_ref[0]
            xk_ref[1:H + 1, 0:W - 1, 2 * C:3 * C] = x_ref[0, :, 1:W, :]

        # 3 MXU matmuls with K = 3C (fills the 256-deep MXU on v6e/v7x); the
        # reshape is layout-free when W % 8 == 0.
        for kh in range(3):
            tap = xk_ref[kh:kh + H, :, :].reshape(Lo, 3 * C)
            wk = w_ref[0, kh * 3 * C:(kh + 1) * 3 * C, :]
            prod = jnp.dot(tap, wk, preferred_element_type=jnp.float32)
            if kh == 0:
                acc_ref[...] = prod
            else:
                acc_ref[...] += prod

        out = acc_ref[...] * s_ref[...] + b_ref[...]              # folded BN
        o_ref[0] = jnp.maximum(out, 0.0).astype(o_ref.dtype)

    out = pl.pallas_call(
        kernel,
        out_shape=jax.ShapeDtypeStruct((N, Lo, Cout), jnp.bfloat16),
        grid_spec=pltpu.PrefetchScalarGridSpec(
            num_scalar_prefetch=1,
            grid=(N, nj),
            in_specs=[
                pl.BlockSpec((1, H, W, C), lambda n, j, est: (n, 0, 0, 0)),
                pl.BlockSpec((1, 9 * C, tco), lambda n, j, est: (est[n], 0, j)),
                pl.BlockSpec((1, tco), lambda n, j, est: (0, j)),
                pl.BlockSpec((1, tco), lambda n, j, est: (0, j)),
            ],
            out_specs=pl.BlockSpec((1, Lo, tco), lambda n, j, est: (n, 0, j)),
            scratch_shapes=[pltpu.VMEM((H + 2, W, 3 * C), jnp.bfloat16),
                            pltpu.VMEM((Lo, tco), jnp.float32)],
        ),
        compiler_params=pltpu.CompilerParams(
            # Cout axis "arbitrary": guarantees the j==0 xk build runs before
            # j>0 tiles of the same sample on the same core.
            dimension_semantics=("parallel", "arbitrary"),
            vmem_limit_bytes=VMEM_LIMIT,
        ),
    )(est_ids, x_nhwc, w_e, scale, bias)
    return out, H, W


# ----------------------------------------------------------------------------
# Fused 3x3 conv (pad=1, stride>1) + folded BN + ReLU, stride-phase layout
# (HBM footprint stays 1x the input; im2col would be 9x)
# ----------------------------------------------------------------------------
def _conv3x3_strided(x_nhwc, w_e, scale, bias, est_ids, *, stride):
    N, H, W, C = x_nhwc.shape
    E, _, Cout = w_e.shape
    s = stride
    Ho = (H - 1) // s + 1
    Wo = (W - 1) // s + 1
    Lo = Ho * Wo
    # rows/cols each stride-phase must carry: ceil(2/s) extra beyond the output.
    Hq = Ho + pl.cdiv(2, s)
    Wq = Wo + pl.cdiv(2, s)
    P = s * s
    assert Hq * s - H - 1 >= 0 and Wq * s - W - 1 >= 0            # pad widths valid
    assert (Ho - 1) * s + 2 < Hq * s and (Wo - 1) * s + 2 < Wq * s  # taps in range

    xp = jnp.pad(x_nhwc, ((0, 0), (1, Hq * s - H - 1), (1, Wq * s - W - 1), (0, 0)))
    phases = jnp.concatenate(
        [xp[:, ph::s, pw::s, :] for ph in range(s) for pw in range(s)], axis=1
    )                                                             # (N, P*Hq, Wq, C)

    fixed = 2 * P * Hq * Wq * C * 2
    per_cout = 2 * 9 * C * 2 + 2 * Lo * 2 + Lo * 4
    tco = choose_cout_tile(Cout, fixed, per_cout, VMEM_BUDGET)

    def kernel(est_ref, ph_ref, w_ref, s_ref, b_ref, o_ref, acc_ref):
        del est_ref
        for kh in range(3):                                       # 9 accumulating MXU matmuls
            for kw in range(3):
                pidx = (kh % s) * s + (kw % s)
                oh, ow = kh // s, kw // s
                tap = ph_ref[0, pidx * Hq + oh: pidx * Hq + oh + Ho, ow: ow + Wo, :]
                wk = w_ref[0, (kh * 3 + kw) * C: (kh * 3 + kw + 1) * C, :]
                prod = jnp.dot(tap.reshape(Lo, C), wk, preferred_element_type=jnp.float32)
                if kh == 0 and kw == 0:
                    acc_ref[...] = prod
                else:
                    acc_ref[...] += prod
        out = acc_ref[...] * s_ref[...] + b_ref[...]              # folded BN
        o_ref[0] = jnp.maximum(out, 0.0).astype(o_ref.dtype)

    out = pl.pallas_call(
        kernel,
        out_shape=jax.ShapeDtypeStruct((N, Lo, Cout), jnp.bfloat16),
        grid_spec=pltpu.PrefetchScalarGridSpec(
            num_scalar_prefetch=1,
            grid=(N, Cout // tco),
            in_specs=[
                pl.BlockSpec((1, P * Hq, Wq, C), lambda n, j, est: (n, 0, 0, 0)),
                pl.BlockSpec((1, 9 * C, tco), lambda n, j, est: (est[n], 0, j)),
                pl.BlockSpec((1, tco), lambda n, j, est: (0, j)),
                pl.BlockSpec((1, tco), lambda n, j, est: (0, j)),
            ],
            out_specs=pl.BlockSpec((1, Lo, tco), lambda n, j, est: (n, 0, j)),
            scratch_shapes=[pltpu.VMEM((Lo, tco), jnp.float32)],
        ),
        compiler_params=pltpu.CompilerParams(
            dimension_semantics=("parallel", "parallel"),
            vmem_limit_bytes=VMEM_LIMIT,
        ),
    )(est_ids, phases, w_e, scale, bias)
    return out, Ho, Wo


def conv3x3_bn_relu(x_nhwc, w_e, scale, bias, est_ids, *, stride):
    if stride == 1:
        return _conv3x3_s1(x_nhwc, w_e, scale, bias, est_ids)
    return _conv3x3_strided(x_nhwc, w_e, scale, bias, est_ids, stride=stride)


# ----------------------------------------------------------------------------
# Glue (plain JAX): BN folding
# ----------------------------------------------------------------------------
def fold_bn(gamma, beta, mean, var, conv_bias):
    s = gamma / jnp.sqrt(var + EPS)
    b = beta - mean * s + conv_bias * s
    return s.reshape(1, -1).astype(jnp.float32), b.reshape(1, -1).astype(jnp.float32)


def pad_cols(a, target):
    return jnp.pad(a, ((0, 0), (0, target - a.shape[1])))


# ----------------------------------------------------------------------------
# Bottleneck core: NHWC, lane-padded channels, bf16 in / bf16 out.
# Chained Bottlenecks should call this directly so NCHW<->NHWC transposes and
# channel pad/slice are paid once per network rather than per block.
# ----------------------------------------------------------------------------
def bottleneck_core(x, p, Cin):
    N, H, W, Cin_p = x.shape
    planes = p["w1"].shape[0]
    exp_planes = p["w3"].shape[0]
    stride = p["stride"]
    E = p["mask1"].shape[0]
    assert N % E == 0

    Cp = round_up(planes, LANE)
    Ce = round_up(exp_planes, LANE)

    # contiguous batch chunks per estimator (matches torch_uncertainty's reshape)
    est_ids = jnp.repeat(jnp.arange(E, dtype=jnp.int32), N // E)

    # ---- conv1 (1x1) + bn1 + relu ----
    w1 = jnp.transpose(p["w1"][:, :, 0, 0], (1, 0))                      # (Cin, planes)
    w1_e = p["mask1"][:, :, None] * w1[None]                             # mask folded into W
    w1_e = jnp.pad(w1_e, ((0, 0), (0, Cin_p - Cin), (0, Cp - planes))).astype(jnp.bfloat16)
    s1, b1 = fold_bn(*p["bn1"], p["b1"])
    s1, b1 = pad_cols(s1, Cp), pad_cols(b1, Cp)
    out1 = fused_pointwise(x.reshape(N, H * W, Cin_p), w1_e, s1, b1, est_ids,
                           relu=True, out_dtype=jnp.bfloat16)
    out1 = out1.reshape(N, H, W, Cp)

    # ---- conv2 (3x3, stride, pad=1) + bn2 + dropout(eval) + relu ----
    # TODO(synk): Dropout2d training-mode channel dropout not implemented (eval-mode identity).
    w2 = jnp.transpose(p["w2"], (2, 3, 1, 0))                            # (3,3,Cin,Cout)
    w2_e = p["mask2"][:, None, None, :, None] * w2[None]                 # (E,3,3,Cin,Cout)
    w2_e = jnp.pad(w2_e, ((0, 0), (0, 0), (0, 0), (0, Cp - planes), (0, Cp - planes)))
    w2_e = w2_e.reshape(E, 9 * Cp, Cp).astype(jnp.bfloat16)              # tap-major (kh,kw,c)
    s2, b2 = fold_bn(*p["bn2"], p["b2"])
    s2, b2 = pad_cols(s2, Cp), pad_cols(b2, Cp)
    out2, Ho, Wo = conv3x3_bn_relu(out1, w2_e, s2, b2, est_ids, stride=stride)
    Lo = Ho * Wo

    # ---- conv3 (1x1) + bn3 + shortcut + relu (one fused kernel, bf16 out) ----
    w3 = jnp.transpose(p["w3"][:, :, 0, 0], (1, 0))                      # (planes, exp)
    w3_e = p["mask3"][:, :, None] * w3[None]
    w3_e = jnp.pad(w3_e, ((0, 0), (0, Cp - planes), (0, Ce - exp_planes))).astype(jnp.bfloat16)
    s3, b3 = fold_bn(*p["bn3"], p["b3"])
    s3, b3 = pad_cols(s3, Ce), pad_cols(b3, Ce)

    if stride != 1 or Cin != exp_planes:
        ws = jnp.transpose(p["ws"][:, :, 0, 0], (1, 0))                  # (Cin, exp)
        ws_e = p["mask_s"][:, :, None] * ws[None]
        ws_e = jnp.pad(ws_e, ((0, 0), (0, Cin_p - Cin), (0, Ce - exp_planes))).astype(jnp.bfloat16)
        ss, bs = fold_bn(*p["bn_s"], p["bs"])
        ss, bs = pad_cols(ss, Ce), pad_cols(bs, Ce)
        # 1x1 strided conv == channel matmul on the subsampled input.
        # TODO(synk): fold this subsample into conv1's kernel (second output) to
        # avoid the extra XLA gather pass over x (review #8).
        xs = x[:, ::stride, ::stride, :].reshape(N, Lo, Cin_p)
        out3 = fused_pointwise(out2, w3_e, s3, b3, est_ids,
                               x2=xs, w2_e=ws_e, scale2=ss, bias2=bs,
                               relu=True, out_dtype=jnp.bfloat16)
    else:
        assert Cin_p == Ce
        res = x.reshape(N, Lo, Ce)
        out3 = fused_pointwise(out2, w3_e, s3, b3, est_ids,
                               residual=res, relu=True, out_dtype=jnp.bfloat16)

    return out3.reshape(N, Ho, Wo, Ce)


# ----------------------------------------------------------------------------
# Public boundary wrapper (NCHW f32 in / NCHW f32 out) for a single block.
# ----------------------------------------------------------------------------
def bottleneck_pallas(x_nchw, p):
    N, Cin, H, W = x_nchw.shape
    exp_planes = p["w3"].shape[0]
    Cin_p = round_up(Cin, LANE)

    # input -> NHWC, lane-pad channels with zeros (padded channels stay exactly 0
    # through every layer since their weight columns / bias entries are 0), bf16.
    x = jnp.transpose(x_nchw, (0, 2, 3, 1))
    x = jnp.pad(x, ((0, 0), (0, 0), (0, 0), (0, Cin_p - Cin))).astype(jnp.bfloat16)

    out = bottleneck_core(x, p, Cin)
    out = out[:, :, :, :exp_planes].astype(jnp.float32)
    return jnp.transpose(out, (0, 3, 1, 2))                              # back to NCHW


# ----------------------------------------------------------------------------
# Pure-JAX reference (mirrors the PyTorch forward, eval mode, f32)
# ----------------------------------------------------------------------------
def bottleneck_ref(x, p):
    def mconv(x, mask, w, b, stride=1, pad=0):
        ne = mask.shape[0]
        N = x.shape[0]
        m = jnp.repeat(mask, N // ne, axis=0)[:, :, None, None]
        y = lax.conv_general_dilated(x * m, w, (stride, stride),
                                     [(pad, pad), (pad, pad)],
                                     dimension_numbers=("NCHW", "OIHW", "NCHW"),
                                     preferred_element_type=jnp.float32)
        return y + b[None, :, None, None]

    def bn(x, params):
        gamma, beta, mean, var = params
        return ((x - mean[None, :, None, None]) / jnp.sqrt(var + EPS)[None, :, None, None]
                * gamma[None, :, None, None] + beta[None, :, None, None])

    stride = p["stride"]
    out = jax.nn.relu(bn(mconv(x, p["mask1"], p["w1"], p["b1"]), p["bn1"]))
    out = jax.nn.relu(bn(mconv(out, p["mask2"], p["w2"], p["b2"], stride, 1), p["bn2"]))
    out = bn(mconv(out, p["mask3"], p["w3"], p["b3"]), p["bn3"])
    if stride != 1 or x.shape[1] != p["w3"].shape[0]:
        sc = bn(mconv(x, p["mask_s"], p["ws"], p["bs"], stride, 0), p["bn_s"])
    else:
        sc = x
    return jax.nn.relu(out + sc)


# ----------------------------------------------------------------------------
# Deterministic parameter construction
# ----------------------------------------------------------------------------
def make_mask(key, num_estimators, channels, scale):
    n_keep = max(1, int(round(channels / scale)))
    rows = []
    for e in range(num_estimators):
        perm = jax.random.permutation(jax.random.fold_in(key, e), channels)
        rows.append(jnp.zeros((channels,), jnp.float32).at[perm[:n_keep]].set(1.0))
    return jnp.stack(rows)


def make_bn(key, c):
    k1, k2, k3, k4 = jax.random.split(key, 4)
    gamma = 1.0 + 0.1 * jax.random.normal(k1, (c,), jnp.float32)
    beta = 0.1 * jax.random.normal(k2, (c,), jnp.float32)
    mean = 0.05 * jax.random.normal(k3, (c,), jnp.float32)
    var = jax.random.uniform(k4, (c,), jnp.float32, 0.5, 1.5)
    return (gamma, beta, mean, var)


def make_params(key, in_planes, planes, stride, num_estimators, scale):
    exp = 4 * planes
    ks = jax.random.split(key, 16)
    return {
        "stride": stride,
        "w1": 0.1 * jax.random.normal(ks[0], (planes, in_planes, 1, 1), jnp.float32),
        "b1": 0.1 * jax.random.normal(ks[1], (planes,), jnp.float32),
        "w2": 0.1 * jax.random.normal(ks[2], (planes, planes, 3, 3), jnp.float32),
        "b2": 0.1 * jax.random.normal(ks[3], (planes,), jnp.float32),
        "w3": 0.1 * jax.random.normal(ks[4], (exp, planes, 1, 1), jnp.float32),
        "b3": 0.1 * jax.random.normal(ks[5], (exp,), jnp.float32),
        "ws": 0.1 * jax.random.normal(ks[6], (exp, in_planes, 1, 1), jnp.float32),
        "bs": 0.1 * jax.random.normal(ks[7], (exp,), jnp.float32),
        "bn1": make_bn(ks[8], planes),
        "bn2": make_bn(ks[9], planes),
        "bn3": make_bn(ks[10], exp),
        "bn_s": make_bn(ks[11], exp),
        "mask1": make_mask(ks[12], num_estimators, in_planes, scale),
        "mask2": make_mask(ks[13], num_estimators, planes, scale),
        "mask3": make_mask(ks[14], num_estimators, planes, scale),
        "mask_s": make_mask(ks[15], num_estimators, in_planes, scale),
    }


# ----------------------------------------------------------------------------
if __name__ == "__main__":
    # TODO(synk): groups > 1 (grouped conv) not implemented; demo uses groups=1.
    num_estimators, scale = 2, 2.0
    batch, H, W = 4, 16, 16          # batch must be divisible by num_estimators
    configs = [
        dict(in_planes=16, planes=8, stride=2),   # projection shortcut (fused into conv3 kernel)
        dict(in_planes=32, planes=8, stride=1),   # identity shortcut (fused residual add)
    ]

    key = jax.random.PRNGKey(0)
    for i, cfg in enumerate(configs):
        kx, kp = jax.random.split(jax.random.fold_in(key, i))
        x = jax.random.normal(kx, (batch, cfg["in_planes"], H, W), jnp.float32)   # NCHW
        params = make_params(kp, cfg["in_planes"], cfg["planes"], cfg["stride"],
                             num_estimators, scale)

        out = jax.block_until_ready(bottleneck_pallas(x, params))
        ref = jax.block_until_ready(bottleneck_ref(x, params))

        Ho = (H - 1) // cfg["stride"] + 1
        assert out.shape == (batch, 4 * cfg["planes"], Ho, Ho), out.shape
        # bf16 activations/weights/output with f32 accumulation vs f32 reference.
        assert jnp.allclose(out, ref, atol=5e-2, rtol=5e-2), float(jnp.abs(out - ref).max())
    print("KERNEL_OK")
</pallas_src>

<mosaic_0001>
module attributes {stable_mosaic.version = 11 : i64} {
  func.func @kernel(%arg0: i32, %arg1: i32, %arg2: memref<4xi32, #tpu.memory_space<smem>>, %arg3: memref<1x256x128xbf16, #tpu.memory_space<vmem>>, %arg4: memref<1x128x128xbf16, #tpu.memory_space<vmem>>, %arg5: memref<1x128xf32, #tpu.memory_space<vmem>>, %arg6: memref<1x128xf32, #tpu.memory_space<vmem>>, %arg7: memref<1x256x128xbf16, #tpu.memory_space<vmem>>) attributes {dimension_semantics = [#tpu.dimension_semantics<parallel>, #tpu.dimension_semantics<parallel>], iteration_bounds = array<i64: 4, 1>, scalar_prefetch = 1 : i64, scratch_operands = 0 : i64, tpu.core_type = #tpu.core_type<tc>, window_params = [{transform_indices = @transform_0, window_bounds = array<i64: 1, 256, 128>}, {transform_indices = @transform_1, window_bounds = array<i64: 1, 128, 128>}, {pipeline_mode = #tpu.pipeline_mode<synchronous>, transform_indices = @transform_2, window_bounds = array<i64: 1, 128>}, {pipeline_mode = #tpu.pipeline_mode<synchronous>, transform_indices = @transform_3, window_bounds = array<i64: 1, 128>}, {transform_indices = @transform_4, window_bounds = array<i64: 1, 256, 128>}]} {
    %c0 = arith.constant 0 : index
    %c0_0 = arith.constant 0 : index
    %c0_1 = arith.constant 0 : index
    %0 = vector.load %arg3[%c0, %c0_0, %c0_1] : memref<1x256x128xbf16, #tpu.memory_space<vmem>>, vector<1x256x128xbf16>
    %1 = vector.shape_cast %0 : vector<1x256x128xbf16> to vector<256x128xbf16>
    %c0_2 = arith.constant 0 : index
    %c0_3 = arith.constant 0 : index
    %c0_4 = arith.constant 0 : index
    %2 = vector.load %arg4[%c0_2, %c0_3, %c0_4] : memref<1x128x128xbf16, #tpu.memory_space<vmem>>, vector<1x128x128xbf16>
    %3 = vector.shape_cast %2 : vector<1x128x128xbf16> to vector<128x128xbf16>
    %cst = arith.constant dense<0.000000e+00> : vector<256x128xf32>
    %4 = tpu.matmul %1, %3, %cst {dimension_numbers = #tpu.dot_dimension_numbers<[1], [0], [0], [1], [0, 0, 1, 1], [], []>} : vector<256x128xbf16>, vector<128x128xbf16>, vector<256x128xf32> -> vector<256x128xf32>
    %c0_5 = arith.constant 0 : index
    %c0_6 = arith.constant 0 : index
    %5 = vector.load %arg5[%c0_5, %c0_6] : memref<1x128xf32, #tpu.memory_space<vmem>>, vector<1x128xf32>
    %6 = vector.broadcast %5 : vector<1x128xf32> to vector<256x128xf32>
    %7 = arith.mulf %4, %6 : vector<256x128xf32>
    %c0_7 = arith.constant 0 : index
    %c0_8 = arith.constant 0 : index
    %8 = vector.load %arg6[%c0_7, %c0_8] : memref<1x128xf32, #tpu.memory_space<vmem>>, vector<1x128xf32>
    %9 = vector.broadcast %8 : vector<1x128xf32> to vector<256x128xf32>
    %10 = arith.addf %7, %9 : vector<256x128xf32>
    %cst_9 = arith.constant 0.000000e+00 : f32
    %11 = vector.broadcast %cst_9 : f32 to vector<256x128xf32>
    %12 = arith.maximumf %10, %11 : vector<256x128xf32>
    %13 = arith.truncf %12 : vector<256x128xf32> to vector<256x128xbf16>
    %c0_10 = arith.constant 0 : index
    %c0_11 = arith.constant 0 : index
    %c0_12 = arith.constant 0 : index
    %14 = vector.load %arg7[%c0_10, %c0_11, %c0_12] : memref<1x256x128xbf16, #tpu.memory_space<vmem>>, vector<1x256x128xbf16>
    %15 = vector.shape_cast %14 : vector<1x256x128xbf16> to vector<256x128xbf16>
    %16 = vector.shape_cast %13 : vector<256x128xbf16> to vector<1x256x128xbf16>
    tpu.vector_store %arg7[%c0_10, %c0_11, %c0_12], %16 {strides = array<i32>} : memref<1x256x128xbf16, #tpu.memory_space<vmem>>, vector<1x256x128xbf16>,
    return
  }
  func.func @transform_0(%arg0: i32, %arg1: i32, %arg2: memref<4xi32, #tpu.memory_space<smem>>) -> (i32, i32, i32) {
    %c0_i32 = arith.constant 0 : i32
    %c0_i32_0 = arith.constant 0 : i32
    return %arg0, %arg1, %c0_i32 : i32, i32, i32
  }
  func.func @transform_1(%arg0: i32, %arg1: i32, %arg2: memref<4xi32, #tpu.memory_space<smem>>) -> (i32, i32, i32) {
    %0 = arith.index_cast %arg0 : i32 to index
    %1 = memref.load %arg2[%0] : memref<4xi32, #tpu.memory_space<smem>>
    %c0_i32 = arith.constant 0 : i32
    %c0_i32_0 = arith.constant 0 : i32
    %c0_i32_1 = arith.constant 0 : i32
    return %1, %c0_i32, %c0_i32_0 : i32, i32, i32
  }
  func.func @transform_2(%arg0: i32, %arg1: i32, %arg2: memref<4xi32, #tpu.memory_space<smem>>) -> (i32, i32) {
    %c0_i32 = arith.constant 0 : i32
    %c0_i32_0 = arith.constant 0 : i32
    %c0_i32_1 = arith.constant 0 : i32
    return %c0_i32, %c0_i32_0 : i32, i32
  }
  func.func @transform_3(%arg0: i32, %arg1: i32, %arg2: memref<4xi32, #tpu.memory_space<smem>>) -> (i32, i32) {
    %c0_i32 = arith.constant 0 : i32
    %c0_i32_0 = arith.constant 0 : i32
    %c0_i32_1 = arith.constant 0 : i32
    return %c0_i32, %c0_i32_0 : i32, i32
  }
  func.func @transform_4(%arg0: i32, %arg1: i32, %arg2: memref<4xi32, #tpu.memory_space<smem>>) -> (i32, i32, i32) {
    %c0_i32 = arith.constant 0 : i32
    %c0_i32_0 = arith.constant 0 : i32
    return %arg0, %arg1, %c0_i32 : i32, i32, i32
  }
}

</mosaic_0001>

<bundles_post_ra>
// kernel: tpu_custom_call.1
= control target key start
LH: loop header
LB: loop body
LE: loop exit
PB: predicated region body
PF: predicated region fallthrough
CT: control target
= control target key end

     0   :  { %s1419_s21 = smov [#allocation3]   ;;  %s1809_s0 = inlined_call_operand.hbm [shape: s32[4], index: 0, kind: input, shape index: {}]   ;;  %s1810_s1 = inlined_call_operand.hbm [shape: bf16[4,256,128], index: 1, kind: input, shape index: {}]   ;;  %s1811_s2 = inlined_call_operand.hbm [shape: bf16[2,128,128], index: 2, kind: input, shape index: {}]   ;;  %s1812_s3 = inlined_call_operand.vmem [shape: f32[1,128], index: 3, kind: input, shape index: {}]   ;;  %s1813_s4 = inlined_call_operand.vmem [shape: f32[1,128], index: 4, kind: input, shape index: {}]   ;;  %s1814_s5 = inlined_call_operand.hbm [shape: bf16[4,256,128], index: 5, kind: output, shape index: {}]  }
   0x1   :  { %1821 = sst [smem:[#allocation21_spill]] %s1810_s1  ;;  %s11_s20 = sshll.u32 %s1809_s0, 4  ;;  %s12_s20 = int_to_ptr.hbm [resolvable:$true] %s11_s20 }
   0x2   :  { %14 = dma.hbm_to_smem %s12_s20, 16, %s1419_s21, [#allocation2] }
   0x3   :  { %1369 = dma.done.wait [#allocation2], 16 }
   0x4   :  { %1370 = vsyncadd [#allocation2], 4294967280 }
   0x5   :  { %17 = sfence }
   0x6   :  { %18 = vsyncpa [#allocation5], 0 }
   0x7   :  { %20 = vsyncpa [#allocation5 + $0x1], 0 }
   0x8   :  { %21 = vsyncpa [#allocation8], 0 }
   0x9   :  { %23 = vsyncpa [#allocation8 + $0x1], 0 }
   0xa   :  { %24 = vsyncpa [#allocation6], 0 }
   0xb   :  { %26 = vsyncpa [#allocation6 + $0x1], 0  ;;  %s1457_s22 = smov 0   ;;  %s1459_s23 = smov 0  }
   0xc   :  { %s1461_s24 = smov 0   ;;  %s1463_s25 = smov 0  }
   0xd   :  { %s1465_s0 = smov 0   ;;  %s1467_s26 = smov 0  }
   0xe   :  { %s1469_s27 = smov 0   ;;  %s1471_s28 = smov 0  }
   0xf   :  { %s1473_s29 = smov 0  }
  0x10 LB: > { %1822 = sst [smem:[#allocation16_spill]] %s1405_s26  ;;  %s870_s30 = sadd.s32 4294967295, %s1417_s29   ;;  %s1417_s29 = sphi %s1473_s29, %s32_s29   ;;  %s1413_s28 = sphi %s1471_s28, %s1845_s28   ;;  %s1409_s27 = sphi %s1469_s27, %s1844_s27   ;;  %s1405_s26 = sphi %s1467_s26, %s1843_s26   ;;  %s1401_s0 = sphi %s1465_s0, %s1850_s0   ;;  %s1397_s25 = sphi %s1463_s25, %s1849_s25   ;;  %s1393_s24 = sphi %s1461_s24, %s1848_s24   ;;  %s1389_s23 = sphi %s1459_s23, %s1847_s23   ;;  %s1385_s22 = sphi %s1457_s22, %s1846_s22  }
  0x11   : > { %1823 = sst [smem:[#allocation17_spill]] %s1413_s28  ;;  %s871_s6 = sadd.s32 4294967294, %s1417_s29  }
  0x12   : > { %s44_s7 = sadd.s32 1, %s1413_s28  ;;  %s53_s8 = sadd.s32 1, %s1405_s26 }
  0x13   : > { %p46_p0 = scmp.ge.s32.totalorder %s44_s7, 4  ;;  %p60_p1 = scmp.ne.s32.totalorder %s1405_s26, %s1401_s0 }
  0x14   : > { %p61_p2 = scmp.eq.s32.totalorder %s1417_s29, 0  ;;  %p66_p3 = scmp.ne.s32.totalorder %s1401_s0, %s1397_s25 }
  0x15   : > { %s1852_s7 = smov (%p46_p0, %s44_s7), 0  ;;  %p1522_p5 = scmp.eq.s32.totalorder %s870_s30, 0 }
  0x16   : > { %1824 = sst [smem:[#allocation18_spill]] %s1852_s7  ;;  %p1518_p4 = por %p61_p2, %p60_p1 }
  0x17   : > { %s48_s11 = ssub.s32 %s1413_s28, %s1852_s7  ;;  %s1529_s12 = sld [smem:[#allocation3 + %s1413_s28]] }
  0x18   : > { %p51_p6 = scmp.eq.s32.totalorder %s48_s11, 0  ;;  %p1536_p7 = por %p1522_p5, %p66_p3 }
  0x19   : > { %s77_s14 = sld [smem:[#allocation3 + %s1852_s7]]  ;;  %p162_p8 = scmp.eq.s32.totalorder %s870_s30, 3 }
  0x1a   : > { %s1542_s15 = scalar_select %p51_p6, %s1405_s26, %s53_s8  }
  0x1b   : > { %p1547_p9 = por %p162_p8, %p60_p1  ;;  %p168_p10 = scmp.eq.s32.totalorder %s871_s6, 3 }
  0x1c   : > { %1828 = sst [smem:[#allocation19_spill]] %s1542_s15  ;;  %p1816_p11 = scmp.lt.s32.totalorder %s1417_s29, 4 }
  0x1d   : > { %p1555_p12 = por %p168_p10, %p66_p3  ;;  %s194_s18 = sand.u32 1, %s1405_s26  }
  0x1e   : > { %s874_s19 = sshll.u32 %s194_s18, 7  ;;  %s985_s20 = sshll.u32 %s1413_s28, 7 }
  0x1f   : > { %s1831_s1 = sld [smem:[#allocation21_spill]]  ;;  %s198_s11 = scalar_lea.vmem [#allocation4], %s874_s19 }
  0x20   : > { %s208_s6 = sshll.u32 %s198_s11, 4  ;;  %p1140_p13 = pnand %p1816_p11, %p1518_p4  ;;  %s209_s6 = int_to_ptr.vmem [resolvable:$true] %s208_s6 }
  0x21   : > { %p880_p0 = scmp.ge.s32.totalorder %s1417_s29, 1  ;;  %s195_s21 = scalar_lea.sflag [#allocation5], %s194_s18 }
  0x22   : > { %s1818_s19 = smov 4   ;;  %p239_p1 = scmp.lt.s32.totalorder %s1417_s29, 5 }
  0x23   : > { %s78_s9 = ssub.s32 %s1529_s12, %s77_s14  ;;  %p88_p6 = scmp.ne.s32.totalorder %s1393_s24, %s1389_s23 }
  0x24   : > { %p1573_p3 = pnand %p880_p0, %p239_p1  ;;  %p79_p4 = scmp.eq.s32.totalorder %s78_s9, 0 }
  0x25   : > { %s205_s8 = scalar_lea.hbm %s1831_s1, %s985_s20  ;;  %s1817_s20 = smov 64  }
  0x26   : > { %s206_s7 = sshll.u32 %s205_s8, 4  ;;  %s81_s8 = sadd.s32 1, %s1393_s24  ;;  %s207_s7 = int_to_ptr.hbm [resolvable:$true] %s206_s7 }
  0x27   : > { %1142 = dma.hbm_to_vmem [thread:$0]  (!%p1140_p13), %s207_s7, 2048, %s209_s6, %s195_s21, %s1817_s20, %s1817_s20, %s1818_s19  }
  0x28   : > { %p94_p8 = scmp.ne.s32.totalorder %s1389_s23, %s1385_s22  ;;  %s218_s18 = sand.u32 1, %s1393_s24  }
  0x29   : > { %s1585_s11 = scalar_select %p79_p4, %s1393_s24, %s81_s8  }
  0x2a   : > { %p90_p10 = por %p88_p6, %p61_p2  ;;  %p1591_p11 = por %p94_p8, %p1522_p5 }
  0x2b   : > { %1833 = sst [smem:[#allocation20_spill]] %s1585_s11  ;;  %s877_s6 = sshll.u32 %s218_s18, 6 }
  0x2c   : > { %p1835_p13 = scmp.lt.s32.totalorder %s1417_s29, 4  ;;  %s222_s9 = scalar_lea.vmem [#allocation7], %s877_s6 }
  0x2d   : > { %s1132_s12 = scalar_select %p90_p10, [#allocation3], [#allocation10] }
  0x2e   : > { %p1597_p0 = pnand %p1835_p13, %p90_p10  ;;  %p1837_p1 = pmov %p1835_p13 }
  0x2f   : > { %s1133_s14 = scalar_select %p90_p10, %s1413_s28, 0 }
  0x30   : > { %s1854_s12 = smov (!%p1837_p1, %s1132_s12), [#allocation11]  ;;  %p1838_p4 = pmov %p1837_p1 }
  0x31   : > { %s231_s10 = sshll.u32 %s222_s9, 4  ;;  %s219_s26 = scalar_lea.sflag [#allocation8], %s218_s18  ;;  %s232_s10 = int_to_ptr.vmem [resolvable:$true] %s231_s10 }
  0x32   : > { %s1856_s14 = smov (!%p1838_p4, %s1133_s14), 0  ;;  %p1279_p5 = pneg %p1597_p0 }
  0x33   : > { %s223_s22 = sld [smem:[%s1854_s12 + %s1856_s14]]  ;;  %s1282_s14 = scalar_lea.hbm %s1811_s2, 128 }
  0x39   : > { %s986_s8 = sshll.u32 %s223_s22, 6 }
  0x3a   : > { %s228_s1 = scalar_lea.hbm %s1811_s2, %s986_s8 }
  0x3b   : > { %s229_s15 = sshll.u32 %s228_s1, 4  ;;  %s230_s15 = int_to_ptr.hbm [resolvable:$true] %s229_s15 }
  0x3c   : > { %s1275_s11 = sshra.s32 %s230_s15, 4  ;;  %s1276_s11 = int_to_ptr.hbm [resolvable:$true] %s1275_s11 }
  0x3d   : > { %s1277_s28 = scalar_lea.hbm %s1276_s11, 64  ;;  %p1283_p10 = scmp.lt.s32.totalorder %s1276_s11, %s1811_s2 }
  0x3e   : > { %p1278_p2 = scmp.ne.s32.totalorder %s1276_s11, %s1277_s28  ;;  %p1284_p13 = scmp.lt.s32.totalorder %s1282_s14, %s1277_s28 }
  0x40   : > { %p1280_p6 = pnand %p1279_p5, %p1278_p2  ;;  %p1285_p1 = por %p1284_p13, %p1283_p10 }
  0x42   : > { %p1281_p8 = pneg %p1280_p6 }
  0x44   : > { %p1286_p4 = pnand %p1285_p1, %p1281_p8 }
  0x46   : > { %1289 = shalt.err (!%p1286_p4)
}
  0x47   : > { %s1839_s1 = smov 4   ;;  %s1840_s20 = smov 64  }
  0x48   : > { %1147 = dma.hbm_to_vmem [thread:$0]  (!%p1597_p0), %s230_s15, 1024, %s232_s10, %s219_s26, %s1840_s20, %s1840_s20, %s1839_s1  }
  0x49   : > { %243 = sbr.rel (%p1573_p3) target bundleno = 317 (0x13d), region = 36  ;;  %s1625_s19 = sand.u32 (!%p1573_p3), 1, %s1401_s0  }
  0x4a   : > { %s881_s28 = sshll.u32 (!%p1573_p3), %s1625_s19, 7  ;;  %s246_s18 = scalar_lea.sflag (!%p1573_p3), [#allocation5], %s1625_s19 }
  0x4b   : > { %s1631_s11 = scalar_lea.vmem (!%p1573_p3), [#allocation4], %s881_s28 }
  0x4e   : > { %1372 = dma.done.wait (%p1536_p7), %s246_s18, 2048  }
  0x4f   : > { %1374 = vsyncadd (%p1536_p7), %s246_s18, 4294965248  ;;  %s255_s26 = sand.u32 1, %s1389_s23  }
  0x50   : > { %s882_s15 = sshll.u32 %s255_s26, 6  ;;  %s256_s30 = scalar_lea.sflag [#allocation8], %s255_s26 }
  0x51   : > { %s1638_s21 = scalar_lea.vmem [#allocation7], %s882_s15 }
  0x52   : > { %1376 = dma.done.wait (%p1591_p11), %s256_s30, 1024  }
  0x53   : > { %1378 = vsyncadd (%p1591_p11), %s256_s30, 4294966272  ;;  %v1010_v0 = vld [vmem:[%s1638_s21 + $0x38] sm:$0xff]  ;;  %v1009_v1 = vld [vmem:[%s1638_s21 + $0x30] sm:$0xff]  ;;  %s1694_s12 = scalar_lea.vmem [#allocation9], %s881_s28  ;;  %s1011_s6 = sshll.u32 %s1409_s27, 7 }
  0x54   : > { %485 = vmatpush.bf16.msra.mxu0 %v1010_v0  ;;  %1107 = vmatpush.bf16.msra.mxu1 %v1010_v0  ;;  %v1008_v2 = vld [vmem:[%s1638_s21 + $0x28] sm:$0xff]  ;;  %v1007_v3 = vld [vmem:[%s1638_s21 + $0x20] sm:$0xff]  ;;  %v1006_v4 = vld [vmem:[%s1638_s21 + $0x18] sm:$0xff]  ;;  %s756_s9 = scalar_lea.hbm %s1814_s5, %s1011_s6  ;;  %s757_s27 = sshll.u32 %s1694_s12, 4  ;;  %s758_s27 = int_to_ptr.vmem [resolvable:$true] %s757_s27 }
  0x55   : > { %1108 = vmatpush.bf16.msra.mxu2 %v1010_v0  ;;  %1109 = vmatpush.bf16.msra.mxu3 %v1010_v0  ;;  %v1005_v5 = vld [vmem:[%s1638_s21 + $0x10] sm:$0xff]  ;;  %v1004_v6 = vld [vmem:[%s1638_s21 + $0x8] sm:$0xff]  ;;  %v1003_v7 = vld [vmem:[%s1638_s21] sm:$0xff]  ;;  %s759_s1 = sshll.u32 %s756_s9, 4  ;;  %s743_s20 = scalar_lea.sflag [#allocation6], %s1625_s19  ;;  %s760_s1 = int_to_ptr.hbm [resolvable:$true] %s759_s1 }
  0x56   : > { %v987_v8 = vld [vmem:[%s1631_s11] sm:$0xff]  ;;  %v988_v12 = vld [vmem:[%s1631_s11 + $0x8] sm:$0xff]  ;;  %v989_v16 = vld [vmem:[%s1631_s11 + $0x10] sm:$0xff]  ;;  %s1319_s28 = sshra.s32 %s760_s1, 4  ;;  %s1325_s15 = scalar_lea.hbm %s1814_s5, 512  ;;  %s1320_s28 = int_to_ptr.hbm [resolvable:$true] %s1319_s28 }
  0x57   : > { %v991_v9 = vld [vmem:[%s1631_s11 + $0x20] sm:$0xff]  ;;  %v992_v13 = vld [vmem:[%s1631_s11 + $0x28] sm:$0xff]  ;;  %v993_v17 = vld [vmem:[%s1631_s11 + $0x30] sm:$0xff]  ;;  %s1321_s18 = scalar_lea.hbm %s1320_s28, 128  ;;  %p1326_p0 = scmp.lt.s32.totalorder %s1320_s28, %s1814_s5 }
  0x58   : > { %486 = vmatpush.bf16.msra.mxu0 %v1009_v1  ;;  %1110 = vmatpush.bf16.msra.mxu1 %v1009_v1  ;;  %v995_v10 = vld [vmem:[%s1631_s11 + $0x40] sm:$0xff]  ;;  %v996_v14 = vld [vmem:[%s1631_s11 + $0x48] sm:$0xff]  ;;  %v997_v18 = vld [vmem:[%s1631_s11 + $0x50] sm:$0xff]  ;;  %p1322_p7 = scmp.ne.s32.totalorder %s1320_s28, %s1321_s18  ;;  %p1327_p2 = scmp.lt.s32.totalorder %s1325_s15, %s1321_s18 }
  0x59   : > { %1111 = vmatpush.bf16.msra.mxu2 %v1009_v1  ;;  %1112 = vmatpush.bf16.msra.mxu3 %v1009_v1  ;;  %v999_v11 = vld [vmem:[%s1631_s11 + $0x60] sm:$0xff]  ;;  %v1000_v15 = vld [vmem:[%s1631_s11 + $0x68] sm:$0xff]  ;;  %v1001_v19 = vld [vmem:[%s1631_s11 + $0x70] sm:$0xff] }
  0x5a   : > { %v990_v20 = vld [vmem:[%s1631_s11 + $0x18] sm:$0xff]  ;;  %v1671_v26 = vld [vmem:[%s1812_s3] ss:$0 sm:$0xff]  ;;  %p1323_p11 = pnand %p1322_p7, %p1547_p9  ;;  %p1328_p5 = por %p1327_p2, %p1326_p0 }
  0x5b   : > { %v994_v21 = vld [vmem:[%s1631_s11 + $0x38] sm:$0xff]  ;;  %v1677_v28 = vld [vmem:[%s1813_s4] ss:$0 sm:$0xff] }
  0x5c   : > { %487 = vmatpush.bf16.msra.mxu0 %v1008_v2  ;;  %1113 = vmatpush.bf16.msra.mxu1 %v1008_v2  ;;  %v998_v22 = vld [vmem:[%s1631_s11 + $0x58] sm:$0xff]  ;;  %p1324_p3 = pneg %p1323_p11 }
  0x5d   : > { %1114 = vmatpush.bf16.msra.mxu2 %v1008_v2  ;;  %1115 = vmatpush.bf16.msra.mxu3 %v1008_v2  ;;  %v1002_v23 = vld [vmem:[%s1631_s11 + $0x78] sm:$0xff] }
  0x5e   : > { %p1329_p6 = pnand %p1328_p5, %p1324_p3 }
  0x60   : > { %488 = vmatpush.bf16.msra.mxu0 %v1007_v3  ;;  %1116 = vmatpush.bf16.msra.mxu1 %v1007_v3 }
  0x61   : > { %1117 = vmatpush.bf16.msra.mxu2 %v1007_v3  ;;  %1118 = vmatpush.bf16.msra.mxu3 %v1007_v3 }
  0x64   : > { %489 = vmatpush.bf16.msra.mxu0 %v1006_v4  ;;  %1119 = vmatpush.bf16.msra.mxu1 %v1006_v4 }
  0x65   : > { %1120 = vmatpush.bf16.msra.mxu2 %v1006_v4  ;;  %1121 = vmatpush.bf16.msra.mxu3 %v1006_v4 }
  0x68   : > { %490 = vmatpush.bf16.msra.mxu0 %v1005_v5  ;;  %1122 = vmatpush.bf16.msra.mxu1 %v1005_v5 }
  0x69   : > { %1123 = vmatpush.bf16.msra.mxu2 %v1005_v5  ;;  %1124 = vmatpush.bf16.msra.mxu3 %v1005_v5 }
  0x6c   : > { %491 = vmatpush.bf16.msra.mxu0 %v1004_v6  ;;  %1125 = vmatpush.bf16.msra.mxu1 %v1004_v6 }
  0x6d   : > { %1126 = vmatpush.bf16.msra.mxu2 %v1004_v6  ;;  %1127 = vmatpush.bf16.msra.mxu3 %v1004_v6 }
  0x70   : > { %492 = vmatpush.bf16.msra.mxu0 %v1003_v7  ;;  %1128 = vmatpush.bf16.msra.mxu1 %v1003_v7 }
  0x71   : > { %1129 = vmatpush.bf16.msra.mxu2 %v1003_v7  ;;  %1130 = vmatpush.bf16.msra.mxu3 %v1003_v7 }
  0x73   : > { %493 = vmatmul.bf16.vlgmr.msra.gmra.mxu0 %v987_v8  ;;  %513 = vmatmul.bf16.vlgmr.msra.gmra.mxu1 %v991_v9 }
  0x74   : > { %533 = vmatmul.bf16.vlgmr.msra.gmra.mxu2 %v995_v10  ;;  %553 = vmatmul.bf16.vlgmr.msra.gmra.mxu3 %v999_v11 }
  0x83   : > { %498 = vmatmul.bf16.gmra.mxu0 %v988_v12  ;;  %518 = vmatmul.bf16.gmra.mxu1 %v992_v13 }
  0x84   : > { %538 = vmatmul.bf16.gmra.mxu2 %v996_v14  ;;  %558 = vmatmul.bf16.gmra.mxu3 %v1000_v15 }
  0x93   : > { %503 = vmatmul.bf16.gmra.mxu0 %v989_v16  ;;  %523 = vmatmul.bf16.gmra.mxu1 %v993_v17 }
  0x94   : > { %543 = vmatmul.bf16.gmra.mxu2 %v997_v18  ;;  %563 = vmatmul.bf16.gmra.mxu3 %v1001_v19 }
  0xa3   : > { %508 = vmatmul.bf16.gmra.mxu0 %v990_v20  ;;  %528 = vmatmul.bf16.gmra.mxu1 %v994_v21 }
  0xa4   : > { %548 = vmatmul.bf16.gmra.mxu2 %v998_v22  ;;  %568 = vmatmul.bf16.gmra.mxu3 %v1002_v23 }
  0xf0   : > { %v494_v24 = vpop.f32.mrf.mxu0  ;;  %v514_v25 = vpop.f32.mrf.mxu1 }
  0xf1   : > { %v578_v27 = vmul.f32 %v1671_v26, %v494_v24  ;;  %v586_v29 = vmul.f32 %v1671_v26, %v514_v25 }
  0xf3   : > { %v614_v34 = vadd.f32 %v1677_v28, %v578_v27  ;;  %v622_v35 = vadd.f32 %v1677_v28, %v586_v29 }
  0xf5   : > { %v646_v42 = vmax.f32 %v614_v34, 0.0  ;;  %v654_v43 = vmax.f32 %v622_v35, 0.0 }
  0xf7   : > { %v534_v30 = vpop.f32.mrf.mxu2  ;;  %v554_v31 = vpop.f32.mrf.mxu3 }
  0xf8   : > { %v496_v32 = vpop.f32.mrf.mxu0  ;;  %v516_v33 = vpop.f32.mrf.mxu1  ;;  %v594_v40 = vmul.f32 %v1671_v26, %v534_v30  ;;  %v602_v41 = vmul.f32 %v1671_v26, %v554_v31 }
  0xf9   : > { %v579_v36 = vmul.f32 %v1671_v26, %v496_v32  ;;  %v587_v37 = vmul.f32 %v1671_v26, %v516_v33 }
  0xfa   : > { %v630_v50 = vadd.f32 %v1677_v28, %v594_v40  ;;  %v638_v51 = vadd.f32 %v1677_v28, %v602_v41 }
  0xfb   : > { %v615_v38 = vadd.f32 %v1677_v28, %v579_v36  ;;  %v623_v39 = vadd.f32 %v1677_v28, %v587_v37 }
  0xfc   : > { %v662_v58 = vmax.f32 %v630_v50, 0.0  ;;  %v670_v59 = vmax.f32 %v638_v51, 0.0 }
  0xfd   : > { %v647_v44 = vmax.f32 %v615_v38, 0.0  ;;  %v655_v45 = vmax.f32 %v623_v39, 0.0 }
  0xff   : > { %v1015_v46 = vpack.c.bf16 %v647_v44, %v646_v42  ;;  %v1035_v47 = vpack.c.bf16 %v655_v45, %v654_v43  ;;  %v536_v48 = vpop.f32.mrf.mxu2  ;;  %v556_v49 = vpop.f32.mrf.mxu3 }
 0x100   : > { %v595_v52 = vmul.f32 %v1671_v26, %v536_v48  ;;  %v603_v53 = vmul.f32 %v1671_v26, %v556_v49  ;;  %v499_v54 = vpop.f32.mrf.mxu0  ;;  %v519_v55 = vpop.f32.mrf.mxu1 }
 0x101   : > { %1016 = vst [vmem:[%s1694_s12] sm:$0xff] %v1015_v46   ;;  %v580_v62 = vmul.f32 %v1671_v26, %v499_v54  ;;  %v588_v63 = vmul.f32 %v1671_v26, %v519_v55 }
 0x102   : > { %1095 = vst [vmem:[%s1694_s12 + $0x20] sm:$0xff] %v1035_v47   ;;  %v631_v56 = vadd.f32 %v1677_v28, %v595_v52  ;;  %v639_v57 = vadd.f32 %v1677_v28, %v603_v53 }
 0x103   : > { %v616_v6 = vadd.f32 %v1677_v28, %v580_v62  ;;  %v624_v7 = vadd.f32 %v1677_v28, %v588_v63 }
 0x104   : > { %v663_v60 = vmax.f32 %v631_v56, 0.0  ;;  %v671_v61 = vmax.f32 %v639_v57, 0.0 }
 0x105   : > { %v648_v14 = vmax.f32 %v616_v6, 0.0  ;;  %v656_v15 = vmax.f32 %v624_v7, 0.0 }
 0x106   : > { %v1055_v0 = vpack.c.bf16 %v663_v60, %v662_v58  ;;  %v1075_v1 = vpack.c.bf16 %v671_v61, %v670_v59 }
 0x107   : > { %v539_v2 = vpop.f32.mrf.mxu2  ;;  %v559_v3 = vpop.f32.mrf.mxu3 }
 0x108   : > { %1099 = vst [vmem:[%s1694_s12 + $0x40] sm:$0xff] %v1055_v0   ;;  %v501_v4 = vpop.f32.mrf.mxu0  ;;  %v521_v5 = vpop.f32.mrf.mxu1  ;;  %v596_v12 = vmul.f32 %v1671_v26, %v539_v2  ;;  %v604_v13 = vmul.f32 %v1671_v26, %v559_v3 }
 0x109   : > { %1103 = vst [vmem:[%s1694_s12 + $0x60] sm:$0xff] %v1075_v1   ;;  %v581_v8 = vmul.f32 %v1671_v26, %v501_v4  ;;  %v589_v9 = vmul.f32 %v1671_v26, %v521_v5 }
 0x10a   : > { %v632_v22 = vadd.f32 %v1677_v28, %v596_v12  ;;  %v640_v23 = vadd.f32 %v1677_v28, %v604_v13 }
 0x10b   : > { %v617_v10 = vadd.f32 %v1677_v28, %v581_v8  ;;  %v625_v11 = vadd.f32 %v1677_v28, %v589_v9 }
 0x10c   : > { %v664_v32 = vmax.f32 %v632_v22, 0.0  ;;  %v672_v33 = vmax.f32 %v640_v23, 0.0 }
 0x10d   : > { %v649_v16 = vmax.f32 %v617_v10, 0.0  ;;  %v657_v17 = vmax.f32 %v625_v11, 0.0 }
 0x10f   : > { %v1020_v18 = vpack.c.bf16 %v649_v16, %v648_v14  ;;  %v1040_v19 = vpack.c.bf16 %v657_v17, %v656_v15  ;;  %v541_v20 = vpop.f32.mrf.mxu2  ;;  %v561_v21 = vpop.f32.mrf.mxu3 }
 0x110   : > { %v597_v24 = vmul.f32 %v1671_v26, %v541_v20  ;;  %v605_v25 = vmul.f32 %v1671_v26, %v561_v21  ;;  %v504_v27 = vpop.f32.mrf.mxu0  ;;  %v524_v29 = vpop.f32.mrf.mxu1 }
 0x111   : > { %1092 = vst [vmem:[%s1694_s12 + $0x8] sm:$0xff] %v1020_v18   ;;  %v582_v36 = vmul.f32 %v1671_v26, %v504_v27  ;;  %v590_v37 = vmul.f32 %v1671_v26, %v524_v29 }
 0x112   : > { %1096 = vst [vmem:[%s1694_s12 + $0x28] sm:$0xff] %v1040_v19   ;;  %v633_v30 = vadd.f32 %v1677_v28, %v597_v24  ;;  %v641_v31 = vadd.f32 %v1677_v28, %v605_v25 }
 0x113   : > { %v618_v44 = vadd.f32 %v1677_v28, %v582_v36  ;;  %v626_v45 = vadd.f32 %v1677_v28, %v590_v37 }
 0x114   : > { %v665_v34 = vmax.f32 %v633_v30, 0.0  ;;  %v673_v35 = vmax.f32 %v641_v31, 0.0 }
 0x115   : > { %v650_v52 = vmax.f32 %v618_v44, 0.0  ;;  %v658_v53 = vmax.f32 %v626_v45, 0.0 }
 0x116   : > { %v1060_v38 = vpack.c.bf16 %v665_v34, %v664_v32  ;;  %v1080_v39 = vpack.c.bf16 %v673_v35, %v672_v33 }
 0x117   : > { %v544_v40 = vpop.f32.mrf.mxu2  ;;  %v564_v41 = vpop.f32.mrf.mxu3 }
 0x118   : > { %1100 = vst [vmem:[%s1694_s12 + $0x48] sm:$0xff] %v1060_v38   ;;  %v506_v42 = vpop.f32.mrf.mxu0  ;;  %v526_v43 = vpop.f32.mrf.mxu1  ;;  %v598_v50 = vmul.f32 %v1671_v26, %v544_v40  ;;  %v606_v51 = vmul.f32 %v1671_v26, %v564_v41 }
 0x119   : > { %1104 = vst [vmem:[%s1694_s12 + $0x68] sm:$0xff] %v1080_v39   ;;  %v583_v46 = vmul.f32 %v1671_v26, %v506_v42  ;;  %v591_v47 = vmul.f32 %v1671_v26, %v526_v43 }
 0x11a   : > { %v634_v60 = vadd.f32 %v1677_v28, %v598_v50  ;;  %v642_v61 = vadd.f32 %v1677_v28, %v606_v51 }
 0x11b   : > { %v619_v48 = vadd.f32 %v1677_v28, %v583_v46  ;;  %v627_v49 = vadd.f32 %v1677_v28, %v591_v47 }
 0x11c   : > { %v666_v4 = vmax.f32 %v634_v60, 0.0  ;;  %v674_v5 = vmax.f32 %v642_v61, 0.0 }
 0x11d   : > { %v651_v54 = vmax.f32 %v619_v48, 0.0  ;;  %v659_v55 = vmax.f32 %v627_v49, 0.0 }
 0x11f   : > { %v1025_v56 = vpack.c.bf16 %v651_v54, %v650_v52  ;;  %v1045_v57 = vpack.c.bf16 %v659_v55, %v658_v53  ;;  %v546_v58 = vpop.f32.mrf.mxu2  ;;  %v566_v59 = vpop.f32.mrf.mxu3 }
 0x120   : > { %v599_v62 = vmul.f32 %v1671_v26, %v546_v58  ;;  %v607_v63 = vmul.f32 %v1671_v26, %v566_v59  ;;  %v509_v0 = vpop.f32.mrf.mxu0  ;;  %v529_v1 = vpop.f32.mrf.mxu1 }
 0x121   : > { %1093 = vst [vmem:[%s1694_s12 + $0x10] sm:$0xff] %v1025_v56   ;;  %v584_v8 = vmul.f32 %v1671_v26, %v509_v0  ;;  %v592_v9 = vmul.f32 %v1671_v26, %v529_v1 }
 0x122   : > { %1097 = vst [vmem:[%s1694_s12 + $0x30] sm:$0xff] %v1045_v57   ;;  %v635_v2 = vadd.f32 %v1677_v28, %v599_v62  ;;  %v643_v3 = vadd.f32 %v1677_v28, %v607_v63 }
 0x123   : > { %v620_v16 = vadd.f32 %v1677_v28, %v584_v8  ;;  %v628_v17 = vadd.f32 %v1677_v28, %v592_v9 }
 0x124   : > { %v667_v6 = vmax.f32 %v635_v2, 0.0  ;;  %v675_v7 = vmax.f32 %v643_v3, 0.0 }
 0x125   : > { %v652_v24 = vmax.f32 %v620_v16, 0.0  ;;  %v660_v25 = vmax.f32 %v628_v17, 0.0 }
 0x126   : > { %v1065_v10 = vpack.c.bf16 %v667_v6, %v666_v4  ;;  %v1085_v11 = vpack.c.bf16 %v675_v7, %v674_v5 }
 0x127   : > { %v549_v12 = vpop.f32.mrf.mxu2  ;;  %v569_v13 = vpop.f32.mrf.mxu3 }
 0x128   : > { %1101 = vst [vmem:[%s1694_s12 + $0x50] sm:$0xff] %v1065_v10   ;;  %v511_v14 = vpop.f32.mrf.mxu0  ;;  %v531_v15 = vpop.f32.mrf.mxu1  ;;  %v600_v22 = vmul.f32 %v1671_v26, %v549_v12  ;;  %v608_v23 = vmul.f32 %v1671_v26, %v569_v13 }
 0x129   : > { %1105 = vst [vmem:[%s1694_s12 + $0x70] sm:$0xff] %v1085_v11   ;;  %v585_v18 = vmul.f32 %v1671_v26, %v511_v14  ;;  %v593_v19 = vmul.f32 %v1671_v26, %v531_v15 }
 0x12a   : > { %v636_v34 = vadd.f32 %v1677_v28, %v600_v22  ;;  %v644_v35 = vadd.f32 %v1677_v28, %v608_v23 }
 0x12b   : > { %v621_v20 = vadd.f32 %v1677_v28, %v585_v18  ;;  %v629_v21 = vadd.f32 %v1677_v28, %v593_v19 }
 0x12c   : > { %v668_v40 = vmax.f32 %v636_v34, 0.0  ;;  %v676_v41 = vmax.f32 %v644_v35, 0.0 }
 0x12d   : > { %v653_v27 = vmax.f32 %v621_v20, 0.0  ;;  %v661_v29 = vmax.f32 %v629_v21, 0.0 }
 0x12f   : > { %v1030_v30 = vpack.c.bf16 %v653_v27, %v652_v24  ;;  %v1050_v31 = vpack.c.bf16 %v661_v29, %v660_v25  ;;  %v551_v32 = vpop.f32.mrf.mxu2  ;;  %v571_v33 = vpop.f32.mrf.mxu3 }
 0x130   : > { %v601_v36 = vmul.f32 %v1671_v26, %v551_v32  ;;  %v609_v37 = vmul.f32 %v1671_v26, %v571_v33 }
 0x131   : > { %1094 = vst [vmem:[%s1694_s12 + $0x18] sm:$0xff] %v1030_v30  }
 0x132   : > { %1098 = vst [vmem:[%s1694_s12 + $0x38] sm:$0xff] %v1050_v31   ;;  %v637_v38 = vadd.f32 %v1677_v28, %v601_v36  ;;  %v645_v39 = vadd.f32 %v1677_v28, %v609_v37 }
 0x134   : > { %v669_v42 = vmax.f32 %v637_v38, 0.0  ;;  %v677_v26 = vmax.f32 %v645_v39, 0.0 }
 0x136   : > { %v1070_v43 = vpack.c.bf16 %v669_v42, %v668_v40  ;;  %v1090_v44 = vpack.c.bf16 %v677_v26, %v676_v41 }
 0x138   : > { %1102 = vst [vmem:[%s1694_s12 + $0x58] sm:$0xff] %v1070_v43  }
 0x139   : > { %1106 = vst [vmem:[%s1694_s12 + $0x78] sm:$0xff] %v1090_v44  }
 0x13a   : > { %1332 = shalt.err (!%p1329_p6)
}
 0x13b   : > { %s1422_s19 = smov 64   ;;  %s1423_s13 = smov 4  }
 0x13c   : > { %1137 = dma.vmem_to_hbm [thread:$0]  (%p1547_p9), %s758_s27, 2048, %s760_s1, %s743_s20, %s1422_s19, %s1422_s19, %s1423_s13  }
 0x13d PF: > { %p1153_p8 = scmp.ge.s32.totalorder %s1417_s29, 2  ;;  %s774_s7 = sand.u32 1, %s1397_s25  }
 0x13e   : > { %s775_s10 = scalar_lea.sflag [#allocation6], %s774_s7 }
 0x13f   : > { %p1149_p10 = pnand %p1153_p8, %p1555_p12 }
 0x141   : > { %p1150_p13 = pneg %p1149_p10 }
 0x143   : > { %1380 = dma.done.wait (%p1150_p13), %s775_s10, 2048  }
 0x144   : > { %1382 = vsyncadd (%p1150_p13), %s775_s10, 4294965248  ;;  %s32_s29 = sadd.s32 1, %s1417_s29   ;;  %s1841_s8 = sld [smem:[#allocation20_spill]] }
 0x145   : > { %p29_p1 = scmp.ge.s32.totalorder %s32_s29, 6   ;;  %s1842_s16 = sld [smem:[#allocation16_spill]] }
 0x146   : > { %s1843_s26 = sld [smem:[#allocation19_spill]]  ;;  %s1846_s22 = smov %s1389_s23 }
 0x147   : > { %s1844_s27 = sld [smem:[#allocation17_spill]]  ;;  %s1847_s23 = smov %s1393_s24 }
 0x148   : > { %s1845_s28 = sld [smem:[#allocation18_spill]]  ;;  %s1849_s25 = smov %s1401_s0 }
 0x149   :  { %31 = sbr.rel (!%p29_p1) target bundleno = 16 (0x10), region = 94 }
 0x14a   : > { %s1848_s24 = smov %s1841_s8 }
 0x14b   : > { %s1850_s0 = smov %s1842_s16 }
 0x14e   :  { %781 = vsyncpa [#allocation5], 1 }
 0x14f   :  { %783 = vsyncpa [#allocation5 + $0x1], 1 }
 0x150   :  { %784 = vsyncpa [#allocation8], 1 }
 0x151   :  { %786 = vsyncpa [#allocation8 + $0x1], 1 }
 0x152   :  { %787 = vsyncpa [#allocation6], 1 }
 0x153   :  { %789 = vsyncpa [#allocation6 + $0x1], 1 }

</bundles_post_ra>
